<compile_context>
chip_gen: v7x
topology: tpu7x:2x2x1
jax: 0.10.0
libtpu: 0.0.40
codegen_flags: <defaults>
</compile_context>

<pallas_src>
import jax
import jax.numpy as jnp
from jax.experimental import pallas as pl
from jax.experimental.pallas import tpu as pltpu


def _round_up(n, m):
    return ((n + m - 1) // m) * m


def _policy_kernel(x_ref, w1_ref, b1_ref, w2_ref, b2_ref, wh_ref, bh_ref, out_ref):
    x = x_ref[...]                                                    # (TB, in) bf16

    # fc1 + ReLU  (bf16 MXU, f32 accumulate)
    h1 = jnp.dot(x, w1_ref[...], preferred_element_type=jnp.float32) + b1_ref[...]
    h1 = jnp.maximum(h1, 0.0).astype(jnp.bfloat16)

    # fc2 + ReLU
    h2 = jnp.dot(h1, w2_ref[...], preferred_element_type=jnp.float32) + b2_ref[...]
    h2 = jnp.maximum(h2, 0.0).astype(jnp.bfloat16)

    # fused heads: one matmul producing [mean_logits | std_logits]
    heads = jnp.dot(h2, wh_ref[...], preferred_element_type=jnp.float32) + bh_ref[...]

    two_out = heads.shape[-1]
    lane = jax.lax.broadcasted_iota(jnp.int32, heads.shape, 1)
    mean = jnp.tanh(heads)                        # EUP
    std = jnp.logaddexp(heads, 0.0)               # stable softplus, EUP
    # lane-select: first half -> tanh head, second half -> softplus head
    out_ref[...] = jnp.where(lane < (two_out // 2), mean, std)


def prepare_params(p):
    """Fuse the two heads and cast weights to bf16 once (biases stay f32)."""
    return dict(
        w1=p["w1"].astype(jnp.bfloat16), b1=p["b1"].astype(jnp.float32),
        w2=p["w2"].astype(jnp.bfloat16), b2=p["b2"].astype(jnp.float32),
        wh=jnp.concatenate([p["wm"], p["ws"]], axis=1).astype(jnp.bfloat16),
        bh=jnp.concatenate([p["bm"], p["bs"]], axis=1).astype(jnp.float32),
    )


def policy_network_forward(x, kp, *, block_b=1024):
    """x: (B, input_dim) float32.  kp: prepared (fused/bf16) params."""
    B, in_dim = x.shape
    hidden = kp["w1"].shape[1]
    two_out = kp["wh"].shape[1]
    out_dim = two_out // 2

    # batch tile: multiple of 8 sublanes, capped so tiles stay tiny vs 64 MiB VMEM (v7x)
    TB = min(block_b, _round_up(B, 8))
    Bp = _round_up(B, TB)

    xb = x.astype(jnp.bfloat16)
    if Bp != B:
        xb = jnp.pad(xb, ((0, Bp - B), (0, 0)))

    def resident(a):
        return pl.BlockSpec(a.shape, lambda i: (0,) * a.ndim)

    param_order = (kp["w1"], kp["b1"], kp["w2"], kp["b2"], kp["wh"], kp["bh"])

    flops = 2 * Bp * (in_dim * hidden + hidden * hidden + hidden * two_out)
    bytes_accessed = (xb.size * xb.dtype.itemsize
                      + sum(a.size * a.dtype.itemsize for a in param_order)
                      + Bp * two_out * 4)
    cost = pl.CostEstimate(flops=flops,
                           transcendentals=2 * Bp * two_out,
                           bytes_accessed=bytes_accessed)

    fused = pl.pallas_call(
        _policy_kernel,
        out_shape=jax.ShapeDtypeStruct((Bp, two_out), jnp.float32),
        grid=(Bp // TB,),
        in_specs=[pl.BlockSpec((TB, in_dim), lambda i: (i, 0))]
                 + [resident(a) for a in param_order],
        out_specs=pl.BlockSpec((TB, two_out), lambda i: (i, 0)),
        compiler_params=pltpu.CompilerParams(dimension_semantics=("parallel",)),
        cost_estimate=cost,
    )(xb, *param_order)

    mean = fused[:B, :out_dim]
    std = fused[:B, out_dim:]
    return mean, std


def init_params(key, input_dim, output_dim, hidden_dim=64):
    """Deterministic synthetic init (PyTorch-style uniform bounds), weights as (in, out), f32."""
    ks = jax.random.split(key, 8)

    def lin(kw, kb, fan_in, fan_out):
        bound = 1.0 / jnp.sqrt(fan_in)
        w = jax.random.uniform(kw, (fan_in, fan_out), jnp.float32, -bound, bound)
        b = jax.random.uniform(kb, (1, fan_out), jnp.float32, -bound, bound)
        return w, b

    w1, b1 = lin(ks[0], ks[1], input_dim, hidden_dim)
    w2, b2 = lin(ks[2], ks[3], hidden_dim, hidden_dim)
    wm, bm = lin(ks[4], ks[5], hidden_dim, output_dim)
    ws, bs = lin(ks[6], ks[7], hidden_dim, output_dim)
    return dict(w1=w1, b1=b1, w2=w2, b2=b2, wm=wm, bm=bm, ws=ws, bs=bs)


if __name__ == "__main__":
    key = jax.random.PRNGKey(0)
    k_x, k_p = jax.random.split(key)

    batch, input_dim, output_dim, hidden_dim = 8, 16, 8, 64
    x = jax.random.normal(k_x, (batch, input_dim), dtype=jnp.float32)
    params_f32 = init_params(k_p, input_dim, output_dim, hidden_dim)
    kparams = prepare_params(params_f32)   # one-time fuse + bf16 cast

    mean, std = policy_network_forward(x, kparams)
    jax.block_until_ready((mean, std))

    # sanity check against pure-JAX f32 reference (tolerance loosened for bf16 matmuls)
    def ref(x, p):
        h1 = jax.nn.relu(x @ p["w1"] + p["b1"])
        h2 = jax.nn.relu(h1 @ p["w2"] + p["b2"])
        return jnp.tanh(h2 @ p["wm"] + p["bm"]), jax.nn.softplus(h2 @ p["ws"] + p["bs"])

    rm, rs = ref(x, params_f32)
    assert mean.shape == (batch, output_dim) and std.shape == (batch, output_dim)
    assert jnp.allclose(mean, rm, atol=3e-2, rtol=3e-2), "mean mismatch"
    assert jnp.allclose(std, rs, atol=3e-2, rtol=3e-2), "std mismatch"

    print("KERNEL_OK")
</pallas_src>

<mosaic_0001>
module attributes {stable_mosaic.version = 11 : i64} {
  func.func @_policy_kernel(%arg0: i32, %arg1: memref<8x16xbf16, #tpu.memory_space<vmem>>, %arg2: memref<16x64xbf16, #tpu.memory_space<vmem>>, %arg3: memref<1x64xf32, #tpu.memory_space<vmem>>, %arg4: memref<64x64xbf16, #tpu.memory_space<vmem>>, %arg5: memref<1x64xf32, #tpu.memory_space<vmem>>, %arg6: memref<64x16xbf16, #tpu.memory_space<vmem>>, %arg7: memref<1x16xf32, #tpu.memory_space<vmem>>, %arg8: memref<8x16xf32, #tpu.memory_space<vmem>>) attributes {dimension_semantics = [#tpu.dimension_semantics<parallel>], iteration_bounds = array<i64: 1>, scalar_prefetch = 0 : i64, scratch_operands = 0 : i64, tpu.core_type = #tpu.core_type<tc>, window_params = [{transform_indices = @transform_0, window_bounds = array<i64: 8, 16>}, {pipeline_mode = #tpu.pipeline_mode<synchronous>, transform_indices = @transform_1, window_bounds = array<i64: 16, 64>}, {pipeline_mode = #tpu.pipeline_mode<synchronous>, transform_indices = @transform_2, window_bounds = array<i64: 1, 64>}, {pipeline_mode = #tpu.pipeline_mode<synchronous>, transform_indices = @transform_3, window_bounds = array<i64: 64, 64>}, {pipeline_mode = #tpu.pipeline_mode<synchronous>, transform_indices = @transform_4, window_bounds = array<i64: 1, 64>}, {pipeline_mode = #tpu.pipeline_mode<synchronous>, transform_indices = @transform_5, window_bounds = array<i64: 64, 16>}, {pipeline_mode = #tpu.pipeline_mode<synchronous>, transform_indices = @transform_6, window_bounds = array<i64: 1, 16>}, {transform_indices = @transform_7, window_bounds = array<i64: 8, 16>}]} {
    %c0 = arith.constant 0 : index
    %c0_0 = arith.constant 0 : index
    %0 = vector.load %arg1[%c0, %c0_0] : memref<8x16xbf16, #tpu.memory_space<vmem>>, vector<8x16xbf16>
    %c0_1 = arith.constant 0 : index
    %c0_2 = arith.constant 0 : index
    %1 = vector.load %arg2[%c0_1, %c0_2] : memref<16x64xbf16, #tpu.memory_space<vmem>>, vector<16x64xbf16>
    %cst = arith.constant dense<0.000000e+00> : vector<8x64xf32>
    %2 = tpu.matmul %0, %1, %cst {dimension_numbers = #tpu.dot_dimension_numbers<[1], [0], [0], [1], [0, 0, 1, 1], [], []>} : vector<8x16xbf16>, vector<16x64xbf16>, vector<8x64xf32> -> vector<8x64xf32>
    %c0_3 = arith.constant 0 : index
    %c0_4 = arith.constant 0 : index
    %3 = vector.load %arg3[%c0_3, %c0_4] : memref<1x64xf32, #tpu.memory_space<vmem>>, vector<1x64xf32>
    %4 = vector.broadcast %3 : vector<1x64xf32> to vector<8x64xf32>
    %5 = arith.addf %2, %4 : vector<8x64xf32>
    %cst_5 = arith.constant 0.000000e+00 : f32
    %6 = vector.broadcast %cst_5 : f32 to vector<8x64xf32>
    %7 = arith.maximumf %5, %6 : vector<8x64xf32>
    %8 = arith.truncf %7 : vector<8x64xf32> to vector<8x64xbf16>
    %c0_6 = arith.constant 0 : index
    %c0_7 = arith.constant 0 : index
    %9 = vector.load %arg4[%c0_6, %c0_7] : memref<64x64xbf16, #tpu.memory_space<vmem>>, vector<64x64xbf16>
    %cst_8 = arith.constant dense<0.000000e+00> : vector<8x64xf32>
    %10 = tpu.matmul %8, %9, %cst_8 {dimension_numbers = #tpu.dot_dimension_numbers<[1], [0], [0], [1], [0, 0, 1, 1], [], []>} : vector<8x64xbf16>, vector<64x64xbf16>, vector<8x64xf32> -> vector<8x64xf32>
    %c0_9 = arith.constant 0 : index
    %c0_10 = arith.constant 0 : index
    %11 = vector.load %arg5[%c0_9, %c0_10] : memref<1x64xf32, #tpu.memory_space<vmem>>, vector<1x64xf32>
    %12 = vector.broadcast %11 : vector<1x64xf32> to vector<8x64xf32>
    %13 = arith.addf %10, %12 : vector<8x64xf32>
    %cst_11 = arith.constant 0.000000e+00 : f32
    %14 = vector.broadcast %cst_11 : f32 to vector<8x64xf32>
    %15 = arith.maximumf %13, %14 : vector<8x64xf32>
    %16 = arith.truncf %15 : vector<8x64xf32> to vector<8x64xbf16>
    %c0_12 = arith.constant 0 : index
    %c0_13 = arith.constant 0 : index
    %17 = vector.load %arg6[%c0_12, %c0_13] : memref<64x16xbf16, #tpu.memory_space<vmem>>, vector<64x16xbf16>
    %cst_14 = arith.constant dense<0.000000e+00> : vector<8x16xf32>
    %18 = tpu.matmul %16, %17, %cst_14 {dimension_numbers = #tpu.dot_dimension_numbers<[1], [0], [0], [1], [0, 0, 1, 1], [], []>} : vector<8x64xbf16>, vector<64x16xbf16>, vector<8x16xf32> -> vector<8x16xf32>
    %c0_15 = arith.constant 0 : index
    %c0_16 = arith.constant 0 : index
    %19 = vector.load %arg7[%c0_15, %c0_16] : memref<1x16xf32, #tpu.memory_space<vmem>>, vector<1x16xf32>
    %20 = vector.broadcast %19 : vector<1x16xf32> to vector<8x16xf32>
    %21 = arith.addf %18, %20 : vector<8x16xf32>
    %22 = tpu.iota {dimensions = array<i32: 1>} : vector<8x16xi32>
    %23 = math.tanh %21 : vector<8x16xf32>
    %cst_17 = arith.constant 0.000000e+00 : f32
    %24 = vector.broadcast %cst_17 : f32 to vector<8x16xf32>
    %25 = arith.maximumf %21, %24 : vector<8x16xf32>
    %26 = vector.broadcast %cst_17 : f32 to vector<8x16xf32>
    %27 = arith.subf %21, %26 : vector<8x16xf32>
    %28 = arith.cmpf one, %27, %27 : vector<8x16xf32>
    %29 = vector.broadcast %cst_17 : f32 to vector<8x16xf32>
    %30 = arith.addf %21, %29 : vector<8x16xf32>
    %31 = math.absf %27 : vector<8x16xf32>
    %cst_18 = arith.constant 0.000000e+00 : f32
    %32 = vector.broadcast %cst_18 : f32 to vector<8x16xf32>
    %33 = arith.subf %32, %31 : vector<8x16xf32>
    %34 = math.exp %33 : vector<8x16xf32>
    %35 = math.log1p %34 : vector<8x16xf32>
    %36 = arith.addf %25, %35 : vector<8x16xf32>
    %37 = arith.select %28, %30, %36 : vector<8x16xi1>, vector<8x16xf32>
    %c8_i32 = arith.constant 8 : i32
    %38 = vector.broadcast %c8_i32 : i32 to vector<8x16xi32>
    %39 = arith.cmpi slt, %22, %38 : vector<8x16xi32>
    %40 = arith.select %39, %23, %37 : vector<8x16xi1>, vector<8x16xf32>
    %c0_19 = arith.constant 0 : index
    %c0_20 = arith.constant 0 : index
    %41 = vector.load %arg8[%c0_19, %c0_20] : memref<8x16xf32, #tpu.memory_space<vmem>>, vector<8x16xf32>
    tpu.vector_store %arg8[%c0_19, %c0_20], %40 {strides = array<i32>} : memref<8x16xf32, #tpu.memory_space<vmem>>, vector<8x16xf32>,
    return
  }
  func.func @transform_0(%arg0: i32) -> (i32, i32) {
    %c0_i32 = arith.constant 0 : i32
    %c0_i32_0 = arith.constant 0 : i32
    return %arg0, %c0_i32 : i32, i32
  }
  func.func @transform_1(%arg0: i32) -> (i32, i32) {
    %c0_i32 = arith.constant 0 : i32
    %c0_i32_0 = arith.constant 0 : i32
    %c0_i32_1 = arith.constant 0 : i32
    return %c0_i32, %c0_i32_0 : i32, i32
  }
  func.func @transform_2(%arg0: i32) -> (i32, i32) {
    %c0_i32 = arith.constant 0 : i32
    %c0_i32_0 = arith.constant 0 : i32
    %c0_i32_1 = arith.constant 0 : i32
    return %c0_i32, %c0_i32_0 : i32, i32
  }
  func.func @transform_3(%arg0: i32) -> (i32, i32) {
    %c0_i32 = arith.constant 0 : i32
    %c0_i32_0 = arith.constant 0 : i32
    %c0_i32_1 = arith.constant 0 : i32
    return %c0_i32, %c0_i32_0 : i32, i32
  }
  func.func @transform_4(%arg0: i32) -> (i32, i32) {
    %c0_i32 = arith.constant 0 : i32
    %c0_i32_0 = arith.constant 0 : i32
    %c0_i32_1 = arith.constant 0 : i32
    return %c0_i32, %c0_i32_0 : i32, i32
  }
  func.func @transform_5(%arg0: i32) -> (i32, i32) {
    %c0_i32 = arith.constant 0 : i32
    %c0_i32_0 = arith.constant 0 : i32
    %c0_i32_1 = arith.constant 0 : i32
    return %c0_i32, %c0_i32_0 : i32, i32
  }
  func.func @transform_6(%arg0: i32) -> (i32, i32) {
    %c0_i32 = arith.constant 0 : i32
    %c0_i32_0 = arith.constant 0 : i32
    %c0_i32_1 = arith.constant 0 : i32
    return %c0_i32, %c0_i32_0 : i32, i32
  }
  func.func @transform_7(%arg0: i32) -> (i32, i32) {
    %c0_i32 = arith.constant 0 : i32
    %c0_i32_0 = arith.constant 0 : i32
    return %arg0, %c0_i32 : i32, i32
  }
}

</mosaic_0001>

<bundles_post_ra>
// kernel: tpu_custom_call.1
= control target key start
LH: loop header
LB: loop body
LE: loop exit
PB: predicated region body
PF: predicated region fallthrough
CT: control target
= control target key end

     0   :  { %v394_v1 = vmov 0.0   ;;  %vm395_vm0 = vmmov 0   ;;  %vm44_vm1 = vcmask 130048   ;;  %s492_s0 = inlined_call_operand.vmem [shape: bf16[8,16], index: 0, kind: input, shape index: {}]   ;;  %s493_s1 = inlined_call_operand.vmem [shape: bf16[16,64], index: 1, kind: input, shape index: {}]   ;;  %s494_s2 = inlined_call_operand.vmem [shape: f32[1,64], index: 2, kind: input, shape index: {}]   ;;  %s495_s3 = inlined_call_operand.vmem [shape: bf16[64,64], index: 3, kind: input, shape index: {}]   ;;  %s496_s4 = inlined_call_operand.vmem [shape: f32[1,64], index: 4, kind: input, shape index: {}]   ;;  %s497_s5 = inlined_call_operand.vmem [shape: bf16[64,16], index: 5, kind: input, shape index: {}]   ;;  %s498_s6 = inlined_call_operand.vmem [shape: f32[1,16], index: 6, kind: input, shape index: {}]   ;;  %s499_s7 = inlined_call_operand.hbm [shape: f32[8,16], index: 7, kind: output, shape index: {}]  }
   0x1   :  { %v355_v0 = vld [vmem:[%s493_s1] sm:$0xff]   ;;  %322 = vmatprep.subr.bf16.mxu0 %v394_v1  ;;  %328 = vmatprep.subr.bf16.mxu1 %v394_v1  ;;  %v357_v4 = vld [vmem:[%s495_s3 + $0x8] sm:$0xff]  }
   0x2   :  { %v28_v2 = vld [vmem:[%s492_s0] sm:$0xf]  ;;  %323 = vmatpush3.bf16.msra.mxu0 %v355_v0  ;;  %324 = vmatprep.mubr.msk.bf16.mxu0 %vm395_vm0, %v394_v1 }
   0x3   :  { %v356_v3 = vld [vmem:[%s495_s3] sm:$0xff]   ;;  %336 = vmatprep.mubr.msk.bf16.mxu1 %vm395_vm0, %v394_v1  ;;  %340 = vmatprep.subr.bf16.mxu0 %v394_v1 }
   0x4   :  { %329 = vmatpush3.bf16.msra.mxu1 %v356_v3 }
   0x5   :  { %325 = vmatmul.mubr.msk.bf16.vlgmr.msra.gmra.mrb[0].mxu0 %vm44_vm1, %v28_v2  ;;  %330 = vmatprep.subr.bf16.mxu1 %v394_v1 }
   0x6   :  { %348 = vmatprep.mubr.msk.bf16.mxu0 %vm395_vm0, %v394_v1 }
   0x8   :  { %331 = vmatpush3.bf16.msra.mxu1 %v357_v4 }
   0x9   :  { %12 = vsyncpa [#allocation3], 0  ;;  %332 = vmatprep.subr.bf16.mxu1 %v394_v1  ;;  %v358_v5 = vld [vmem:[%s495_s3 + $0x10] sm:$0xff]   ;;  %v359_v6 = vld [vmem:[%s495_s3 + $0x18] sm:$0xff]   ;;  %vm129_vm2 = vcmask 523264   ;;  %v257_v39 = vlaneseq }
   0xa   :  { %v360_v7 = vld [vmem:[%s497_s5] sm:$0xff]   ;;  %v361_v8 = vld [vmem:[%s497_s5 + $0x8] sm:$0xff]   ;;  %v362_v17 = vld [vmem:[%s497_s5 + $0x10] sm:$0xff]  }
   0xb   :  { %341 = vmatpush3.bf16.msra.mxu0 %v360_v7  ;;  %v295_v9 = vld [vmem:[%s494_s2] ss:$0 sm:$0xff]  ;;  %v363_v18 = vld [vmem:[%s497_s5 + $0x18] sm:$0xff]   ;;  %v258_v43 = vand.u32 127, %v257_v39 }
   0xc   :  { %333 = vmatpush3.bf16.msra.mxu1 %v358_v5  ;;  %342 = vmatprep.subr.bf16.mxu0 %v394_v1  ;;  %v298_v19 = vld [vmem:[%s496_s4] ss:$0 sm:$0xff]  ;;  %s396_s4 = smov [#allocation2]  }
   0xd   :  { %334 = vmatprep.subr.bf16.mxu1 %v394_v1  ;;  %v304_v27 = vld [vmem:[%s498_s6] ss:$0 sm:$0xff]  ;;  %s287_s5 = sshll.u32 %s396_s4, 4  ;;  %vm278_vm4 = vcmp.lt.s32.totalorder %v258_v43, 8  ;;  %s288_s5 = int_to_ptr.vmem [resolvable:$true] %s287_s5 }
   0xe   :  { %s370_s6 = scalar_lea.vmem %s288_s5, 128  ;;  %p375_p1 = scmp.lt.s32.totalorder %s288_s5, %s288_s5 }
   0xf   :  { %343 = vmatpush3.bf16.msra.mxu0 %v361_v8  ;;  %p371_p0 = scmp.ne.s32.totalorder %s288_s5, %s370_s6  ;;  %p376_p2 = scmp.lt.s32.totalorder %s370_s6, %s370_s6 }
  0x10   :  { %335 = vmatpush3.bf16.msra.mxu1 %v359_v6  ;;  %344 = vmatprep.subr.bf16.mxu0 %v394_v1 }
  0x11   :  { %p377_p3 = por %p376_p2, %p375_p1 }
  0x13   :  { %345 = vmatpush3.bf16.msra.mxu0 %v362_v17  ;;  %p378_p4 = pnand %p377_p3, %p371_p0 }
  0x14   :  { %346 = vmatprep.subr.bf16.mxu0 %v394_v1 }
  0x17   :  { %347 = vmatpush3.bf16.msra.mxu0 %v363_v18 }
  0xd8   :  { %v82_v10 = vpop.f32.mrb[0].mxu0 }
  0xd9   :  { %v83_v11 = vadd.f32 %v295_v9, %v82_v10  ;;  %v326_v12 = vpop.f32.mrb[1].mxu0 }
  0xda   :  { %v85_v13 = vpop.f32.mrb[2].mxu0 }
  0xdb   :  { %v88_v14 = vmax.f32 %v83_v11, 0.0  ;;  %v327_v15 = vpop.f32.mrb[3].mxu0 }
  0xdd   :  { %v89_v16 = vpack.c.bf16 %v88_v14, %v88_v14 }
  0xdf   :  { %337 = vmatmul.mubr.msk.bf16.vlgmr.msra.gmra.mrb[0].mxu1 %vm129_vm2, %v89_v16 }
 0x1b2   :  { %v167_v20 = vpop.f32.mrb[0].mxu1 }
 0x1b3   :  { %v168_v21 = vadd.f32 %v298_v19, %v167_v20  ;;  %v338_v22 = vpop.f32.mrb[1].mxu1 }
 0x1b4   :  { %v170_v23 = vpop.f32.mrb[2].mxu1 }
 0x1b5   :  { %v173_v24 = vmax.f32 %v168_v21, 0.0  ;;  %v339_v25 = vpop.f32.mrb[3].mxu1 }
 0x1b7   :  { %v174_v26 = vpack.c.bf16 %v173_v24, %v173_v24 }
 0x1b9   :  { %349 = vmatmul.mubr.msk.bf16.vlgmr.msra.gmra.mrb[4].mxu0 %vm129_vm2, %v174_v26 }
 0x28c   :  { %v251_v28 = vpop.f32.mrb[4].mxu0 }
 0x28d   :  { %v252_v29 = vadd.f32 %v304_v27, %v251_v28  ;;  %v350_v30 = vpop.f32.mrb[5].mxu0 }
 0x28e   :  { %v254_v31 = vpop.f32.mrb[6].mxu0 }
 0x28f   :  { %v263_v32 = vand.u32 2147483647, %v252_v29  ;;  %v351_v33 = vpop.f32.mrb[7].mxu0  ;;  %v260_v46 = vmax.f32 %v252_v29, 0.0  ;;  %vm261_vm5 = vcmp.ne.f32.partialorder %v252_v29, %v252_v29 }
 0x291   :  { %v264_v34 = vsub.f32 0.0, %v263_v32 }
 0x293   :  { %v265_v35 = vmul.f32 1.442695, %v264_v34 }
 0x295   :  { %364 = vpow2.f32 %v265_v35 }
 0x29f   :  { %v365_v36 = vpop.eup %364 }
 0x2a0   :  { %v267_v37 = vadd.f32 1.0, %v365_v36  ;;  %v270_v38 = vmul.f32 -0.5, %v365_v36  ;;  %v273_v41 = vand.u32 2147483647, %v365_v36 }
 0x2a2   :  { %366 = vlog2.f32 %v267_v37  ;;  %v271_v40 = vadd.f32 1.0, %v270_v38  ;;  %vm274_vm3 = vcmp.lt.f32.partialorder %v273_v41, 0.0004427343 }
 0x2a3   :  { %368 = vtanh.f32 %v252_v29 }
 0x2a4   :  { %v272_v45 = vmul.f32 %v365_v36, %v271_v40 }
 0x2ac   :  { %v367_v42 = vpop.eup %366 }
 0x2ad   :  { %v269_v44 = vmul.f32 0.6931472, %v367_v42  ;;  %v369_v49 = vpop.eup %368 }
 0x2af   :  { %v275_v47 = vsel %vm274_vm3, %v272_v45, %v269_v44 }
 0x2b0   :  { %v276_v48 = vadd.f32 %v275_v47, %v260_v46 }
 0x2b2   :  { %v277_v50 = vsel %vm261_vm5, %v252_v29, %v276_v48 }
 0x2b3   :  { %v279_v51 = vsel %vm278_vm4, %v369_v49, %v277_v50 }
 0x2b4   :  { %280 = vst.msk [vmem:[#allocation2] sm:$0xff] %vm44_vm1, %v279_v51 }
 0x2b5   :  { %381 = shalt.err (!%p378_p4)
}
 0x2b6   :  { %s382_s25 = scalar_lea.hbm %s499_s7, 128 }
 0x2b7   :  { %p383_p5 = scmp.ne.s32.totalorder %s499_s7, %s382_s25  ;;  %p386_p6 = scmp.lt.u32.totalorder %s382_s25, %s499_s7 }
 0x2b9   :  { %p388_p7 = pnand %p386_p6, %p383_p5 }
 0x2bb   :  { %391 = shalt.err (!%p388_p7)
}
 0x2bc   :  { %290 = dma.vmem_to_hbm [thread:$0]  %s288_s5, 128, %s499_s7, [#allocation3]  }
 0x2bd   :  { %392 = dma.done.wait [#allocation3], 128  }
 0x2be   :  { %393 = vsyncadd [#allocation3], 4294967168 }
 0x2bf   :  { %294 = vsyncpa [#allocation3], 1 }

</bundles_post_ra>
